<compile_context>
chip_gen: v7x
topology: tpu7x:2x2x1
jax: 0.10.0
libtpu: 0.0.40
codegen_flags: <defaults>
</compile_context>

<pallas_src>
import functools
import math

import jax
import jax.numpy as jnp
from jax import lax
from jax.experimental import pallas as pl
from jax.experimental.pallas import tpu as pltpu


def _vmem_limit_bytes():
    """Per-generation scoped-VMEM limit: ~3/4 of physical, capped at 96 MiB."""
    try:
        info = pltpu.get_tpu_info()
        cap = getattr(info, "vmem_capacity_bytes", None)
        if cap:
            return int(min(96 * 1024 * 1024, cap * 3 // 4))
    except Exception:
        pass
    return 48 * 1024 * 1024  # safe everywhere (v7x physical VMEM is 64 MiB)


VMEM_LIMIT_BYTES = _vmem_limit_bytes()


def _pick_tile(dim, target, align):
    """Largest tile <= target that divides `dim` and is `align`-aligned.
    Falls back to the full dimension (always a legal block)."""
    if dim <= target:
        return dim
    t = (target // align) * align
    while t >= align:
        if dim % t == 0:
            return t
        t -= align
    return dim


# ----------------------------------------------------------------------------
# Pallas kernel 1: tiled dense projection  y = x @ W + b   (bf16 MXU, f32 acc)
# ----------------------------------------------------------------------------
def _linear_kernel(x_ref, w_ref, b_ref, o_ref, acc_ref):
    k = pl.program_id(2)

    @pl.when(k == 0)
    def _():
        acc_ref[...] = jnp.zeros_like(acc_ref)

    acc_ref[...] += jnp.dot(x_ref[...], w_ref[...],
                            preferred_element_type=jnp.float32)

    @pl.when(k == pl.num_programs(2) - 1)
    def _():
        o_ref[...] = (acc_ref[...] + b_ref[...].astype(jnp.float32)).astype(o_ref.dtype)


def pallas_linear(x, w, b, *, out_dtype=None, tm=512, tn=512, tk=1024):
    """x: [M, K], w: [K, N] (bf16), b: [N] (f32) -> [M, N]."""
    if x.dtype != w.dtype:
        x = x.astype(w.dtype)                    # bf16 MXU operands
    M, K = x.shape
    _, N = w.shape
    out_dtype = out_dtype or x.dtype
    tm = _pick_tile(M, tm, 8)
    tn = _pick_tile(N, tn, 128)
    tk = _pick_tile(K, tk, 128)
    grid = (M // tm, N // tn, K // tk)

    return pl.pallas_call(
        _linear_kernel,
        out_shape=jax.ShapeDtypeStruct((M, N), out_dtype),
        grid=grid,
        in_specs=[
            pl.BlockSpec((tm, tk), lambda i, j, k: (i, k)),
            pl.BlockSpec((tk, tn), lambda i, j, k: (k, j)),
            pl.BlockSpec((1, tn), lambda i, j, k: (0, j)),
        ],
        out_specs=pl.BlockSpec((tm, tn), lambda i, j, k: (i, j)),
        scratch_shapes=[pltpu.VMEM((tm, tn), jnp.float32)],
        compiler_params=pltpu.CompilerParams(
            dimension_semantics=("parallel", "parallel", "arbitrary"),
            vmem_limit_bytes=VMEM_LIMIT_BYTES),
    )(x, w, b.reshape(1, N))


# ----------------------------------------------------------------------------
# Pallas kernel 2: flash-style attention core (online softmax, no probs).
# Shared body for both layouts; grid: (B, nH, Sq tiles, Skv tiles).
# ----------------------------------------------------------------------------
def _flash_attn_kernel(*refs, has_mask):
    if has_mask:
        q_ref, k_ref, v_ref, mask_ref, o_ref, m_sc, l_sc, acc_sc = refs
    else:
        q_ref, k_ref, v_ref, o_ref, m_sc, l_sc, acc_sc = refs
        mask_ref = None

    ki = pl.program_id(3)

    @pl.when(ki == 0)
    def _():
        m_sc[...] = jnp.full_like(m_sc, -jnp.inf)
        l_sc[...] = jnp.zeros_like(l_sc)
        acc_sc[...] = jnp.zeros_like(acc_sc)

    # NT contraction: bf16 operands, f32 accumulation, no K transpose relayout.
    # (softmax scale already folded into the Q projection weights)
    s = lax.dot_general(q_ref[...], k_ref[...], (((1,), (1,)), ((), ())),
                        preferred_element_type=jnp.float32)     # [tq, tkv] f32
    if mask_ref is not None:
        s = s + mask_ref[...].astype(jnp.float32)

    m_prev = m_sc[...]
    m_new = jnp.maximum(m_prev, jnp.max(s, axis=-1, keepdims=True))
    # Guard against fully-masked (-inf) rows: avoid inf - inf = NaN.
    m_safe = jnp.where(m_new == -jnp.inf, 0.0, m_new)
    alpha = jnp.exp(m_prev - m_safe)
    p = jnp.exp(s - m_safe)
    l_sc[...] = alpha * l_sc[...] + jnp.sum(p, axis=-1, keepdims=True)
    acc_sc[...] = alpha * acc_sc[...] + jnp.dot(
        p.astype(v_ref.dtype), v_ref[...], preferred_element_type=jnp.float32)
    m_sc[...] = m_new

    @pl.when(ki == pl.num_programs(3) - 1)
    def _():
        l = l_sc[...]
        l = jnp.where(l == 0.0, 1.0, l)          # fully-masked rows -> output 0
        o_ref[...] = (acc_sc[...] *
                      pl.reciprocal(l, approx=True)).astype(o_ref.dtype)


def _mask_maps(mask):
    """Index-map builders for an additive mask with broadcastable B / head dims."""
    mb, mh = mask.shape[0], mask.shape[1]
    def m4(b, h, qi, ki):
        return (b if mb > 1 else 0, h if mh > 1 else 0, qi, ki)
    def m3(b, h, qi):
        return (b if mb > 1 else 0, h if mh > 1 else 0, qi, 0)
    return m4, m3


def flash_attention_packed(qkv, mask, *, num_heads, head_dim,
                           out_dtype=None, tq=512, tkv=512):
    """Transpose-free attention: qkv is the packed projection [B, S, 3*H] (heads
    contiguous in Q|K|V order); returns ctx directly in [B, S, H] layout.
    Requires head_dim % 128 == 0 (lane constraint for head-sized last-dim blocks)."""
    B, S, H3 = qkv.shape
    H = H3 // 3
    nH, D = num_heads, head_dim
    out_dtype = out_dtype or qkv.dtype
    tq = _pick_tile(S, tq, 16)
    tkv = _pick_tile(S, tkv, 128)
    has_mask = mask is not None
    kernel = functools.partial(_flash_attn_kernel, has_mask=has_mask)

    q_spec = pl.BlockSpec((None, tq, D), lambda b, h, qi, ki: (b, qi, h))
    k_spec = pl.BlockSpec((None, tkv, D), lambda b, h, qi, ki: (b, ki, num_heads + h))
    v_spec = pl.BlockSpec((None, tkv, D), lambda b, h, qi, ki: (b, ki, 2 * num_heads + h))
    in_specs = [q_spec, k_spec, v_spec]
    args = [qkv, qkv, qkv]
    if has_mask:
        m4, _ = _mask_maps(mask)
        in_specs.append(pl.BlockSpec((None, None, tq, tkv), m4))
        args.append(mask)

    return pl.pallas_call(
        kernel,
        out_shape=jax.ShapeDtypeStruct((B, S, H), out_dtype),
        grid=(B, nH, S // tq, S // tkv),
        in_specs=in_specs,
        out_specs=pl.BlockSpec((None, tq, D), lambda b, h, qi, ki: (b, qi, h)),
        scratch_shapes=[
            pltpu.VMEM((tq, 1), jnp.float32),    # running max
            pltpu.VMEM((tq, 1), jnp.float32),    # running denom
            pltpu.VMEM((tq, D), jnp.float32),    # f32 accumulator
        ],
        compiler_params=pltpu.CompilerParams(
            dimension_semantics=("parallel", "parallel", "parallel", "arbitrary"),
            vmem_limit_bytes=VMEM_LIMIT_BYTES),
    )(*args)


def flash_attention(q, k, v, mask=None, *, tq=512, tkv=512):
    """Fallback layout: q,k,v [B, nH, S, D]; returns ctx [B, nH, S, D]."""
    B, nH, S, D = q.shape
    tq = _pick_tile(S, tq, 16)
    tkv = _pick_tile(S, tkv, 128)
    has_mask = mask is not None
    kernel = functools.partial(_flash_attn_kernel, has_mask=has_mask)

    q_spec = pl.BlockSpec((None, None, tq, D), lambda b, h, qi, ki: (b, h, qi, 0))
    kv_spec = pl.BlockSpec((None, None, tkv, D), lambda b, h, qi, ki: (b, h, ki, 0))
    in_specs = [q_spec, kv_spec, kv_spec]
    args = [q, k, v]
    if has_mask:
        m4, _ = _mask_maps(mask)
        in_specs.append(pl.BlockSpec((None, None, tq, tkv), m4))
        args.append(mask)

    return pl.pallas_call(
        kernel,
        out_shape=jax.ShapeDtypeStruct((B, nH, S, D), q.dtype),
        grid=(B, nH, S // tq, S // tkv),
        in_specs=in_specs,
        out_specs=pl.BlockSpec((None, None, tq, D), lambda b, h, qi, ki: (b, h, qi, 0)),
        scratch_shapes=[
            pltpu.VMEM((tq, 1), jnp.float32),
            pltpu.VMEM((tq, 1), jnp.float32),
            pltpu.VMEM((tq, D), jnp.float32),
        ],
        compiler_params=pltpu.CompilerParams(
            dimension_semantics=("parallel", "parallel", "parallel", "arbitrary"),
            vmem_limit_bytes=VMEM_LIMIT_BYTES),
    )(*args)


# ----------------------------------------------------------------------------
# Pallas kernel 3: attention core that also emits softmax probabilities
# (only compiled when output_attentions=True). Exact normalization (no approx).
# TODO(synk): kv-tiled two-pass softmax + bf16 probs would reduce VMEM/HBM here
#             for long sequences; kept simple since this is the debug path.
# ----------------------------------------------------------------------------
def _attn_probs_kernel(*refs, has_mask):
    if has_mask:
        q_ref, k_ref, v_ref, mask_ref, o_ref, p_ref = refs
    else:
        q_ref, k_ref, v_ref, o_ref, p_ref = refs
        mask_ref = None

    s = lax.dot_general(q_ref[...], k_ref[...], (((1,), (1,)), ((), ())),
                        preferred_element_type=jnp.float32)     # [tq, S] f32
    if mask_ref is not None:
        s = s + mask_ref[...].astype(jnp.float32)
    m = jnp.max(s, axis=-1, keepdims=True)
    m = jnp.where(m == -jnp.inf, 0.0, m)
    p = jnp.exp(s - m)
    denom = jnp.sum(p, axis=-1, keepdims=True)
    denom = jnp.where(denom == 0.0, 1.0, denom)
    p = p / denom                                               # exact softmax
    o = jnp.dot(p.astype(v_ref.dtype), v_ref[...], preferred_element_type=jnp.float32)

    o_ref[...] = o.astype(o_ref.dtype)
    p_ref[...] = p.astype(p_ref.dtype)


def attention_with_probs(q, k, v, mask=None, *, tq=512):
    """q,k,v: [B, nH, S, D] -> (ctx [B, nH, S, D], probs [B, nH, S, S] f32)."""
    B, nH, S, D = q.shape
    tq = _pick_tile(S, tq, 16)
    has_mask = mask is not None
    kernel = functools.partial(_attn_probs_kernel, has_mask=has_mask)

    q_spec = pl.BlockSpec((None, None, tq, D), lambda b, h, qi: (b, h, qi, 0))
    kv_spec = pl.BlockSpec((None, None, S, D), lambda b, h, qi: (b, h, 0, 0))
    in_specs = [q_spec, kv_spec, kv_spec]
    args = [q, k, v]
    if has_mask:
        _, m3 = _mask_maps(mask)
        in_specs.append(pl.BlockSpec((None, None, tq, S), m3))
        args.append(mask)

    return pl.pallas_call(
        kernel,
        out_shape=(
            jax.ShapeDtypeStruct((B, nH, S, D), q.dtype),
            jax.ShapeDtypeStruct((B, nH, S, S), jnp.float32),
        ),
        grid=(B, nH, S // tq),
        in_specs=in_specs,
        out_specs=(
            pl.BlockSpec((None, None, tq, D), lambda b, h, qi: (b, h, qi, 0)),
            pl.BlockSpec((None, None, tq, S), lambda b, h, qi: (b, h, qi, 0)),
        ),
        compiler_params=pltpu.CompilerParams(
            dimension_semantics=("parallel", "parallel", "parallel"),
            vmem_limit_bytes=VMEM_LIMIT_BYTES),
    )(*args)


# ----------------------------------------------------------------------------
# Module wrapper
# ----------------------------------------------------------------------------
class VLMAttentionPallas:
    def __init__(self, hidden_size: int, num_heads: int, key, param_dtype=jnp.bfloat16):
        assert hidden_size % num_heads == 0
        self.hidden_size = hidden_size
        self.num_heads = num_heads
        self.head_dim = hidden_size // num_heads

        keys = jax.random.split(key, 8)
        sc = 0.02
        H = hidden_size
        wq = sc * jax.random.normal(keys[0], (H, H), jnp.float32)
        bq = sc * jax.random.normal(keys[1], (H,), jnp.float32)
        wk = sc * jax.random.normal(keys[2], (H, H), jnp.float32)
        bk = sc * jax.random.normal(keys[3], (H,), jnp.float32)
        wv = sc * jax.random.normal(keys[4], (H, H), jnp.float32)
        bv = sc * jax.random.normal(keys[5], (H,), jnp.float32)

        # Fold the softmax 1/sqrt(D) scale into the Q projection (weights + bias):
        # removes a tq x D VPU multiply from every attention inner step.
        qscale = 1.0 / math.sqrt(self.head_dim)
        wq = wq * qscale
        bq = bq * qscale

        # Fused QKV projection weights in bf16: one matmul, one HBM pass over x,
        # native MXU operand format on v5e/v6e/v7x.
        self.wqkv = jnp.concatenate([wq, wk, wv], axis=1).astype(param_dtype)   # [H, 3H]
        self.bqkv = jnp.concatenate([bq, bk, bv], axis=0).astype(jnp.float32)   # [3H]
        self.wo = (sc * jax.random.normal(keys[6], (H, H), jnp.float32)).astype(param_dtype)
        self.bo = (sc * jax.random.normal(keys[7], (H,), jnp.float32)).astype(jnp.float32)

    def __call__(self, hidden_states, attention_mask=None, output_attentions=False):
        B, S, H = hidden_states.shape
        nH, D = self.num_heads, self.head_dim
        in_dtype = hidden_states.dtype

        x2 = hidden_states.reshape(B * S, H).astype(jnp.bfloat16)
        qkv = pallas_linear(x2, self.wqkv, self.bqkv, out_dtype=jnp.bfloat16)   # [B*S, 3H]

        mask = None
        if attention_mask is not None:
            # TODO(synk): additive float mask assumed (module contract); streamed in
            # bf16 to halve mask HBM traffic.
            mask = attention_mask
            if mask.ndim == 2:
                mask = mask[None, None]
            elif mask.ndim == 3:
                mask = mask[:, None]
            mask = mask.astype(jnp.bfloat16)

        if output_attentions:
            qkv4 = qkv.reshape(B, S, 3, nH, D).transpose(2, 0, 3, 1, 4)
            q, k, v = qkv4[0], qkv4[1], qkv4[2]
            ctx, probs = attention_with_probs(q, k, v, mask)
            ctx = ctx.transpose(0, 2, 1, 3).reshape(B * S, H)
        elif D % 128 == 0:
            # Transpose-free fast path: flash kernel reads Q/K/V straight from the
            # packed projection and writes ctx in [B, S, H] layout.
            ctx = flash_attention_packed(qkv.reshape(B, S, 3 * H), mask,
                                         num_heads=nH, head_dim=D,
                                         out_dtype=jnp.bfloat16)
            ctx = ctx.reshape(B * S, H)
            probs = None
        else:
            # Small head dims (D not a multiple of 128) fall back to XLA relayout.
            qkv4 = qkv.reshape(B, S, 3, nH, D).transpose(2, 0, 3, 1, 4)
            q, k, v = qkv4[0], qkv4[1], qkv4[2]
            ctx = flash_attention(q, k, v, mask)
            ctx = ctx.transpose(0, 2, 1, 3).reshape(B * S, H)
            probs = None

        out = pallas_linear(ctx.astype(jnp.bfloat16), self.wo, self.bo,
                            out_dtype=in_dtype).reshape(B, S, H)
        return out, probs


# ----------------------------------------------------------------------------
# Demo / smoke test
# ----------------------------------------------------------------------------
def _reference(module, x, m):
    """Pure-JAX reference (f32 math on the same bf16 weights; scale already folded)."""
    B, S, H = x.shape
    nH, D = module.num_heads, module.head_dim
    wqkv = module.wqkv.astype(jnp.float32)
    bqkv = module.bqkv.astype(jnp.float32)
    wo = module.wo.astype(jnp.float32)
    bo = module.bo.astype(jnp.float32)
    qkv = x.reshape(B * S, H) @ wqkv + bqkv
    qkv = qkv.reshape(B, S, 3, nH, D).transpose(2, 0, 3, 1, 4)
    q, k, v = qkv[0], qkv[1], qkv[2]
    s = jnp.einsum("bhqd,bhkd->bhqk", q, k)          # 1/sqrt(D) already in wqkv
    if m is not None:
        s = s + m.astype(jnp.float32)
    p = jax.nn.softmax(s, axis=-1)
    ctx = jnp.einsum("bhqk,bhkd->bhqd", p, v)
    ctx = ctx.transpose(0, 2, 1, 3).reshape(B * S, H)
    return (ctx @ wo + bo).reshape(B, S, H), p


if __name__ == "__main__":
    key = jax.random.PRNGKey(0)
    k_param, k_x, k_param2, k_x2 = jax.random.split(key, 4)

    # ---- small shapes (fallback layout path, D = 8) ----
    B, S, H, nH = 2, 8, 32, 4
    module = VLMAttentionPallas(hidden_size=H, num_heads=nH, key=k_param)

    hidden_states = jax.random.normal(k_x, (B, S, H), jnp.float32)
    causal = jnp.tril(jnp.ones((S, S), jnp.float32))
    attention_mask = jnp.where(causal == 1.0, 0.0, -1e9)[None, None, :, :]
    attention_mask = jnp.broadcast_to(attention_mask, (B, 1, S, S))

    out_fast, w_none = module(hidden_states, attention_mask, output_attentions=False)
    out_p, weights = module(hidden_states, attention_mask, output_attentions=True)
    out_nomask, _ = module(hidden_states, None, output_attentions=False)
    jax.block_until_ready((out_fast, out_p, weights, out_nomask))

    ref_out, ref_p = _reference(module, hidden_states, attention_mask)
    ref_out_nm, _ = _reference(module, hidden_states, None)

    assert out_fast.shape == (B, S, H) and out_p.shape == (B, S, H)
    assert w_none is None
    assert weights.shape == (B, nH, S, S)
    assert bool(jnp.allclose(jnp.sum(weights, axis=-1), 1.0, atol=2e-3))
    assert bool(jnp.allclose(weights, ref_p, atol=2e-2))
    assert bool(jnp.allclose(out_fast, ref_out, atol=2e-2, rtol=5e-2))
    assert bool(jnp.allclose(out_p, ref_out, atol=2e-2, rtol=5e-2))
    assert bool(jnp.allclose(out_nomask, ref_out_nm, atol=2e-2, rtol=5e-2))

    # ---- head_dim = 128: exercises the transpose-free packed-QKV flash path ----
    B2, S2, H2, nH2 = 1, 128, 512, 4
    module2 = VLMAttentionPallas(hidden_size=H2, num_heads=nH2, key=k_param2)
    x2 = jax.random.normal(k_x2, (B2, S2, H2), jnp.float32)
    causal2 = jnp.tril(jnp.ones((S2, S2), jnp.float32))
    mask2 = jnp.where(causal2 == 1.0, 0.0, -1e9)[None, None, :, :]

    out2, _ = module2(x2, mask2, output_attentions=False)
    jax.block_until_ready(out2)
    ref2, _ = _reference(module2, x2, mask2)
    assert out2.shape == (B2, S2, H2)
    assert bool(jnp.allclose(out2, ref2, atol=5e-2, rtol=5e-2))

    print("KERNEL_OK")
</pallas_src>

<mosaic_0001>
module attributes {stable_mosaic.version = 11 : i64} {
  func.func @_linear_kernel(%arg0: i32, %arg1: i32, %arg2: i32, %arg3: memref<16x32xbf16, #tpu.memory_space<vmem>>, %arg4: memref<32x96xbf16, #tpu.memory_space<vmem>>, %arg5: memref<1x96xf32, #tpu.memory_space<vmem>>, %arg6: memref<16x96xbf16, #tpu.memory_space<vmem>>, %arg7: memref<16x96xf32, #tpu.memory_space<vmem>>) attributes {dimension_semantics = [#tpu.dimension_semantics<parallel>, #tpu.dimension_semantics<parallel>, #tpu.dimension_semantics<arbitrary>], iteration_bounds = array<i64: 1, 1, 1>, scalar_prefetch = 0 : i64, scratch_operands = 1 : i64, tpu.core_type = #tpu.core_type<tc>, window_params = [{transform_indices = @transform_0, window_bounds = array<i64: 16, 32>}, {transform_indices = @transform_1, window_bounds = array<i64: 32, 96>}, {transform_indices = @transform_2, window_bounds = array<i64: 1, 96>}, {transform_indices = @transform_3, window_bounds = array<i64: 16, 96>}]} {
    %c0_i32 = arith.constant 0 : i32
    %0 = arith.cmpi eq, %arg2, %c0_i32 : i32
    %1 = arith.extui %0 : i1 to i32
    %c0_i32_0 = arith.constant 0 : i32
    %2 = arith.cmpi ne, %1, %c0_i32_0 : i32
    scf.if %2 {
      %cst_10 = arith.constant 0.000000e+00 : f32
      %12 = vector.broadcast %cst_10 : f32 to vector<16x96xf32>
      %c0_11 = arith.constant 0 : index
      %c0_12 = arith.constant 0 : index
      %13 = vector.load %arg7[%c0_11, %c0_12] : memref<16x96xf32, #tpu.memory_space<vmem>>, vector<16x96xf32>
      tpu.vector_store %arg7[%c0_11, %c0_12], %12 {strides = array<i32>} : memref<16x96xf32, #tpu.memory_space<vmem>>, vector<16x96xf32>,
    } else {
    }
    %c0 = arith.constant 0 : index
    %c0_1 = arith.constant 0 : index
    %3 = vector.load %arg7[%c0, %c0_1] : memref<16x96xf32, #tpu.memory_space<vmem>>, vector<16x96xf32>
    %c0_2 = arith.constant 0 : index
    %c0_3 = arith.constant 0 : index
    %4 = vector.load %arg3[%c0_2, %c0_3] : memref<16x32xbf16, #tpu.memory_space<vmem>>, vector<16x32xbf16>
    %c0_4 = arith.constant 0 : index
    %c0_5 = arith.constant 0 : index
    %5 = vector.load %arg4[%c0_4, %c0_5] : memref<32x96xbf16, #tpu.memory_space<vmem>>, vector<32x96xbf16>
    %cst = arith.constant dense<0.000000e+00> : vector<16x96xf32>
    %6 = tpu.matmul %4, %5, %cst {dimension_numbers = #tpu.dot_dimension_numbers<[1], [0], [0], [1], [0, 0, 1, 1], [], []>} : vector<16x32xbf16>, vector<32x96xbf16>, vector<16x96xf32> -> vector<16x96xf32>
    %7 = arith.addf %3, %6 : vector<16x96xf32>
    %c0_6 = arith.constant 0 : index
    %c0_7 = arith.constant 0 : index
    %8 = vector.load %arg7[%c0_6, %c0_7] : memref<16x96xf32, #tpu.memory_space<vmem>>, vector<16x96xf32>
    tpu.vector_store %arg7[%c0_6, %c0_7], %7 {strides = array<i32>} : memref<16x96xf32, #tpu.memory_space<vmem>>, vector<16x96xf32>,
    %c0_i32_8 = arith.constant 0 : i32
    %9 = arith.cmpi eq, %arg2, %c0_i32_8 : i32
    %10 = arith.extui %9 : i1 to i32
    %c0_i32_9 = arith.constant 0 : i32
    %11 = arith.cmpi ne, %10, %c0_i32_9 : i32
    scf.if %11 {
      %c0_10 = arith.constant 0 : index
      %c0_11 = arith.constant 0 : index
      %12 = vector.load %arg7[%c0_10, %c0_11] : memref<16x96xf32, #tpu.memory_space<vmem>>, vector<16x96xf32>
      %c0_12 = arith.constant 0 : index
      %c0_13 = arith.constant 0 : index
      %13 = vector.load %arg5[%c0_12, %c0_13] : memref<1x96xf32, #tpu.memory_space<vmem>>, vector<1x96xf32>
      %14 = vector.broadcast %13 : vector<1x96xf32> to vector<16x96xf32>
      %15 = arith.addf %12, %14 : vector<16x96xf32>
      %16 = arith.truncf %15 : vector<16x96xf32> to vector<16x96xbf16>
      %c0_14 = arith.constant 0 : index
      %c0_15 = arith.constant 0 : index
      %17 = vector.load %arg6[%c0_14, %c0_15] : memref<16x96xbf16, #tpu.memory_space<vmem>>, vector<16x96xbf16>
      tpu.vector_store %arg6[%c0_14, %c0_15], %16 {strides = array<i32>} : memref<16x96xbf16, #tpu.memory_space<vmem>>, vector<16x96xbf16>,
    } else {
    }
    return
  }
  func.func @transform_0(%arg0: i32, %arg1: i32, %arg2: i32) -> (i32, i32) {
    %c0_i32 = arith.constant 0 : i32
    return %arg0, %arg2 : i32, i32
  }
  func.func @transform_1(%arg0: i32, %arg1: i32, %arg2: i32) -> (i32, i32) {
    %c0_i32 = arith.constant 0 : i32
    return %arg2, %arg1 : i32, i32
  }
  func.func @transform_2(%arg0: i32, %arg1: i32, %arg2: i32) -> (i32, i32) {
    %c0_i32 = arith.constant 0 : i32
    %c0_i32_0 = arith.constant 0 : i32
    return %c0_i32, %arg1 : i32, i32
  }
  func.func @transform_3(%arg0: i32, %arg1: i32, %arg2: i32) -> (i32, i32) {
    %c0_i32 = arith.constant 0 : i32
    return %arg0, %arg1 : i32, i32
  }
}

</mosaic_0001>

<bundles_post_ra>
// kernel: tpu_custom_call.1
= control target key start
LH: loop header
LB: loop body
LE: loop exit
PB: predicated region body
PF: predicated region fallthrough
CT: control target
= control target key end

     0   :  { %8 = vsyncpa [#allocation4], 0  ;;  %s350_s0 = inlined_call_operand.hbm [shape: bf16[16,32], index: 0, kind: input, shape index: {}]   ;;  %s351_s1 = inlined_call_operand.hbm [shape: bf16[32,96], index: 1, kind: input, shape index: {}]   ;;  %s352_s2 = inlined_call_operand.vmem [shape: f32[1,96], index: 2, kind: input, shape index: {}]   ;;  %s353_s3 = inlined_call_operand.hbm [shape: bf16[16,96], index: 3, kind: output, shape index: {}]  }
   0x1   :  { %9 = vsyncpa [#allocation7], 0 }
   0x2   :  { %10 = vsyncpa [#allocation5], 0  ;;  %s271_s12 = smov [#allocation3]   ;;  %s199_s16 = scalar_lea.hbm %s350_s0, 128 }
   0x3   :  { %s16_s13 = sshll.u32 %s271_s12, 4  ;;  %p200_p0 = scmp.ne.s32.totalorder %s350_s0, %s199_s16  ;;  %s17_s13 = int_to_ptr.vmem [resolvable:$true] %s16_s13 }
   0x4   :  { %p203_p1 = scmp.lt.u32.totalorder %s199_s16, %s350_s0 }
   0x6   :  { %p205_p2 = pnand %p203_p1, %p200_p0 }
   0x8   :  { %208 = shalt.err (!%p205_p2)
}
   0x9   :  { %s209_s21 = scalar_lea.vmem %s17_s13, 128  ;;  %p214_p4 = scmp.lt.s32.totalorder %s17_s13, %s17_s13 }
   0xa   :  { %p210_p3 = scmp.ne.s32.totalorder %s17_s13, %s209_s21  ;;  %p215_p5 = scmp.lt.s32.totalorder %s209_s21, %s209_s21 }
   0xc   :  { %p216_p6 = por %p215_p5, %p214_p4 }
   0xe   :  { %p217_p7 = pnand %p216_p6, %p210_p3 }
  0x10   :  { %220 = shalt.err (!%p217_p7)
}
  0x11   :  { %s272_s22 = smov 64   ;;  %s273_s23 = smov 4  }
  0x12   :  { %22 = dma.hbm_to_vmem [thread:$0]  %s350_s0, 128, %s17_s13, [#allocation4], %s272_s22, %s272_s22, %s273_s23  }
  0x13   :  { %s274_s26 = smov [#allocation6]   ;;  %s221_s30 = scalar_lea.hbm %s351_s1, 256 }
  0x14   :  { %s28_s27 = sshll.u32 %s274_s26, 4  ;;  %p222_p8 = scmp.ne.s32.totalorder %s351_s1, %s221_s30  ;;  %s29_s27 = int_to_ptr.vmem [resolvable:$true] %s28_s27 }
  0x15   :  { %p225_p9 = scmp.lt.u32.totalorder %s221_s30, %s351_s1 }
  0x17   :  { %p227_p10 = pnand %p225_p9, %p222_p8 }
  0x19   :  { %230 = shalt.err (!%p227_p10)
}
  0x1a   :  { %s231_s8 = scalar_lea.vmem %s29_s27, 256  ;;  %p236_p12 = scmp.lt.s32.totalorder %s29_s27, %s29_s27 }
  0x1b   :  { %p232_p11 = scmp.ne.s32.totalorder %s29_s27, %s231_s8  ;;  %p237_p13 = scmp.lt.s32.totalorder %s231_s8, %s231_s8 }
  0x1d   :  { %p238_p0 = por %p237_p13, %p236_p12 }
  0x1f   :  { %p239_p1 = pnand %p238_p0, %p232_p11 }
  0x21   :  { %242 = shalt.err (!%p239_p1)
}
  0x22   :  { %34 = dma.hbm_to_vmem [thread:$0]  %s351_s1, 256, %s29_s27, [#allocation7], %s272_s22, %s272_s22, %s273_s23  }
  0x23   :  { %265 = dma.done.wait [#allocation4], 128  }
  0x24   :  { %266 = vsyncadd [#allocation4], 4294967168 }
  0x25   :  { %267 = dma.done.wait [#allocation7], 256  }
  0x26   :  { %268 = vsyncadd [#allocation7], 4294967040  ;;  %vm48_vm0 = vcmask 785408   ;;  %v275_v0 = vmov 0.0   ;;  %vm276_vm1 = vmmov 0   ;;  %v196_v1 = vld [vmem:[#allocation6] sm:$0xff]  }
  0x27   :  { %49 = vst.msk [vmem:[#allocation2] sm:$0xff] %vm48_vm0, %v275_v0  ;;  %50 = vst.msk [vmem:[#allocation2 + $0x8] sm:$0xff] %vm48_vm0, %v275_v0  ;;  %181 = vmatprep.subr.bf16.mxu0 %v275_v0  ;;  %185 = vmatprep.mubr.msk.bf16.mxu0 %vm276_vm1, %v275_v0  ;;  %v197_v2 = vld [vmem:[#allocation6 + $0x8] sm:$0xff]   ;;  %v198_v3 = vld [vmem:[#allocation3] sm:$0xff]   ;;  %vm76_vm2 = vcmask 261120   ;;  %vm148_vm3 = vcmask 781312  }
  0x28   :  { %182 = vmatpush3.bf16.msra.mxu0 %v196_v1  ;;  %v173_v12 = vld [vmem:[%s352_s2] ss:$0 sm:$0xff]  ;;  %s277_s11 = smov [#allocation8]  }
  0x29   :  { %183 = vmatprep.subr.bf16.mxu0 %v275_v0  ;;  %s156_s12 = sshll.u32 %s277_s11, 4  ;;  %s157_s12 = int_to_ptr.vmem [resolvable:$true] %s156_s12 }
  0x2a   :  { %s243_s13 = scalar_lea.vmem %s157_s12, 128  ;;  %p248_p3 = scmp.lt.s32.totalorder %s157_s12, %s157_s12 }
  0x2b   :  { %p244_p2 = scmp.ne.s32.totalorder %s157_s12, %s243_s13  ;;  %p249_p4 = scmp.lt.s32.totalorder %s243_s13, %s243_s13 }
  0x2c   :  { %184 = vmatpush3.bf16.msra.mxu0 %v197_v2 }
  0x2d   :  { %p250_p5 = por %p249_p4, %p248_p3 }
  0x2e   :  { %v51_v4 = vld [vmem:[#allocation2] sm:$0xff]  ;;  %v52_v6 = vld [vmem:[#allocation2 + $0x8] sm:$0xff] }
  0x2f   :  { %186 = vmatmul.mubr.msk.bf16.vlgmr.msra.gmra.mrb[0].mxu0 %vm76_vm2, %v198_v3  ;;  %p251_p6 = pnand %p250_p5, %p244_p2 }
 0x102   :  { %v114_v5 = vpop.f32.mrb[0].mxu0 }
 0x103   :  { %v121_v7 = vadd.f32 %v114_v5, %v51_v4  ;;  %v187_v8 = vpop.f32.mrb[1].mxu0 }
 0x104   :  { %v117_v9 = vpop.f32.mrb[2].mxu0 }
 0x105   :  { %124 = vst.msk [vmem:[#allocation2] sm:$0xff] %vm48_vm0, %v121_v7  ;;  %v122_v10 = vadd.f32 %v117_v9, %v52_v6  ;;  %v188_v11 = vpop.f32.mrb[3].mxu0 }
 0x107   :  { %125 = vst.msk [vmem:[#allocation2 + $0x8] sm:$0xff] %vm48_vm0, %v122_v10 }
 0x10c   :  { %v129_v13 = vld [vmem:[#allocation2] sm:$0xff] }
 0x10d   :  { %v138_v14 = vadd.f32 %v173_v12, %v129_v13 }
 0x10e   :  { %v130_v15 = vld [vmem:[#allocation2 + $0x8] sm:$0xff] }
 0x10f   :  { %v139_v16 = vadd.f32 %v173_v12, %v130_v15  ;;  %v176_v17 = vpack.c.bf16 %v138_v14, %v138_v14 }
 0x111   :  { %v177_v18 = vpack.c.bf16 %v139_v16, %v139_v16  ;;  %149 = vst.msk [vmem:[#allocation8] sm:$0xf] %vm148_vm3, %v176_v17 }
 0x113   :  { %150 = vst.msk [vmem:[#allocation8 + $0x4] sm:$0xf] %vm148_vm3, %v177_v18 }
 0x114   :  { %254 = shalt.err (!%p251_p6)
}
 0x115   :  { %s255_s15 = scalar_lea.hbm %s353_s3, 128 }
 0x116   :  { %p256_p7 = scmp.ne.s32.totalorder %s353_s3, %s255_s15  ;;  %p259_p8 = scmp.lt.u32.totalorder %s255_s15, %s353_s3 }
 0x118   :  { %p261_p9 = pnand %p259_p8, %p256_p7 }
 0x11a   :  { %264 = shalt.err (!%p261_p9)
}
 0x11b   :  { %162 = dma.vmem_to_hbm [thread:$0]  %s157_s12, 128, %s353_s3, [#allocation5], %s272_s22, %s272_s22, %s273_s23  }
 0x11c   :  { %269 = dma.done.wait [#allocation5], 128  }
 0x11d   :  { %270 = vsyncadd [#allocation5], 4294967168 }
 0x11e   :  { %166 = vsyncpa [#allocation4], 1 }
 0x11f   :  { %167 = vsyncpa [#allocation7], 1 }
 0x120   :  { %168 = vsyncpa [#allocation5], 1 }

</bundles_post_ra>
